<compile_context>
chip_gen: v5e
topology: v5e:2x2
jax: 0.10.0
libtpu: 0.0.40
codegen_flags: <defaults>
</compile_context>

<pallas_src>
import functools
import math

import jax
import jax.numpy as jnp
from jax import lax
from jax.experimental import pallas as pl
from jax.experimental.pallas import tpu as pltpu


def _round_up(x, m):
    return ((x + m - 1) // m) * m


def _pick_tile(total, cap, align):
    """Largest divisor of `total` that is a multiple of `align` and <= cap,
    else `total` itself (a full-extent block is always legal)."""
    cap = min(cap, total)
    t = cap - cap % align
    while t >= align:
        if total % t == 0:
            return t
        t -= align
    return total


def _device_config():
    """Generation-aware tile caps / VMEM limit / core-group count."""
    kind = ""
    try:
        kind = jax.devices()[0].device_kind.lower()
    except Exception:
        pass
    if "v7" in kind:
        # 64 MiB physical VMEM, 2 TensorCores per chip.
        return dict(row_tile=1024, n_tile=256, vmem_limit=48 * 1024 * 1024, n_groups=2)
    if "v5e" in kind or "v5 lite" in kind or "v5lite" in kind or "v6" in kind:
        # 128 MiB physical VMEM, single TensorCore: go big.
        return dict(row_tile=2048, n_tile=512, vmem_limit=96 * 1024 * 1024, n_groups=1)
    # Unknown / older parts: proven-safe conservative settings.
    return dict(row_tile=1024, n_tile=256, vmem_limit=48 * 1024 * 1024, n_groups=1)


# ----------------------------------------------------------------------------
# Kernel 1: 3-NN inverse-distance interpolation, tiled over (batch, N-tiles).
# ----------------------------------------------------------------------------
def _interp_kernel(xyz1_ref, xyz2_ref, pts2_ref, out_ref):
    x1 = xyz1_ref[0]          # [TN, 8] f32 queries (channels on lanes, zero-padded)
    x2 = xyz2_ref[0]          # [8, S]  f32 samples (channels on sublanes, points on lanes)
    p2 = pts2_ref[0]          # [S, D2] bf16 features
    tn = x1.shape[0]
    s = x2.shape[1]

    # Squared distances via the MXU: |x1|^2 + |x2|^2 - 2*x1@x2.  A bf16 hi/lo
    # 3-pass split keeps ~16-bit accuracy so neighbour selection matches f32.
    h1 = x1.astype(jnp.bfloat16)
    l1 = (x1 - h1.astype(jnp.float32)).astype(jnp.bfloat16)
    h2 = x2.astype(jnp.bfloat16)
    l2 = (x2 - h2.astype(jnp.float32)).astype(jnp.bfloat16)
    cross = jnp.dot(h1, h2, preferred_element_type=jnp.float32)
    cross = cross + jnp.dot(h1, l2, preferred_element_type=jnp.float32)
    cross = cross + jnp.dot(l1, h2, preferred_element_type=jnp.float32)

    x1sq = jnp.sum(x1 * x1, axis=1, keepdims=True)      # [TN, 1]
    x2sq = jnp.sum(x2 * x2, axis=0, keepdims=True)      # [1, S]
    d = jnp.maximum((x2sq - 2.0 * cross) + x1sq, 0.0)
    dp = d + 1e-8                                        # >= 1e-8: no subnormals

    # Pack (distance, lane index) into a single monotonically-ordered f32 key so
    # each neighbour extraction is ONE cross-lane min (fused min + argmin).
    lane_bits = max(1, (s - 1).bit_length())
    idx_mask = (1 << lane_bits) - 1
    iota_s = lax.broadcasted_iota(jnp.int32, (tn, s), 1)
    key_bits = jnp.bitwise_or(
        jnp.bitwise_and(pltpu.bitcast(dp, jnp.int32), jnp.int32(~idx_mask)),
        iota_s)
    key0 = pltpu.bitcast(key_bits, jnp.float32)

    # Three cross-lane mins just to find the 3rd-smallest key threshold.
    key = key0
    kmin = None
    for it in range(3):
        kmin = jnp.min(key, axis=-1, keepdims=True)       # [TN, 1]
        if it < 2:
            key = jnp.where(key == kmin, jnp.float32(jnp.inf), key)

    # One-pass sparse weights using the EXACT (untruncated) distances; the
    # reciprocal rides the otherwise-idle EUP slot.
    recip = pl.reciprocal(dp, approx=True)                # [TN, S]
    w = jnp.where(key0 <= kmin, recip, 0.0)               # exactly 3 nonzeros / row
    rsum = jnp.sum(w, axis=-1, keepdims=True)             # [TN, 1]

    # Sparse-weight @ points2 on the MXU (bf16 operands, f32 accumulation),
    # normalized on the small [TN, D2] output; emit bf16 (half the HBM bytes).
    acc = jnp.dot(w.astype(jnp.bfloat16), p2, preferred_element_type=jnp.float32)
    out_ref[0] = (acc * pl.reciprocal(rsum, approx=True)).astype(out_ref.dtype)


def interpolate(xyz1_bnc, xyz2_bcs, pts2_bsd, n_tile_cap, vmem_limit):
    B, N, _ = xyz1_bnc.shape
    S = xyz2_bcs.shape[2]
    D2 = pts2_bsd.shape[2]

    # Lane-dense S: pad with far-away sentinel points (never selected as NN).
    S_pad = _round_up(S, 128)
    if S_pad > S:
        xyz2_bcs = jnp.pad(xyz2_bcs, ((0, 0), (0, 0), (0, S_pad - S)),
                           constant_values=1e18)
        pts2_bsd = jnp.pad(pts2_bsd, ((0, 0), (0, S_pad - S), (0, 0)))
    # Pad coordinate channels 3 -> 8 (zeros) so the MXU cross term has a clean K.
    xyz2_bcs = jnp.pad(xyz2_bcs, ((0, 0), (0, 8 - xyz2_bcs.shape[1]), (0, 0)))

    N_pad = _round_up(N, 16)                              # bf16 output sublane packing
    if N_pad > N:
        xyz1_bnc = jnp.pad(xyz1_bnc, ((0, 0), (0, N_pad - N), (0, 0)))
    xyz1_bnc = jnp.pad(xyz1_bnc, ((0, 0), (0, 0), (0, 8 - xyz1_bnc.shape[2])))

    # VMEM guard (mostly for v7x's 64 MiB): ~10 live [tn, S_pad] f32 temporaries
    # plus double-buffered inputs must fit well under the scoped limit.
    budget = int(vmem_limit * 0.5)
    tn_cap = max(16, n_tile_cap)

    def live_bytes(t):
        return (t * S_pad * 4 * 10
                + 2 * (S_pad * D2 * 2 + 8 * S_pad * 4 + t * 8 * 4 + t * D2 * 2))

    while tn_cap > 16 and live_bytes(tn_cap) > budget:
        tn_cap //= 2
    tn = _pick_tile(N_pad, max(16, tn_cap), 16)

    out = pl.pallas_call(
        _interp_kernel,
        out_shape=jax.ShapeDtypeStruct((B, N_pad, D2), jnp.bfloat16),
        grid=(B, N_pad // tn),
        in_specs=[
            pl.BlockSpec((1, tn, 8), lambda b, n: (b, n, 0)),
            pl.BlockSpec((1, 8, S_pad), lambda b, n: (b, 0, 0)),   # constant over N tiles
            pl.BlockSpec((1, S_pad, D2), lambda b, n: (b, 0, 0)),  # constant over N tiles
        ],
        out_specs=pl.BlockSpec((1, tn, D2), lambda b, n: (b, n, 0)),
        compiler_params=pltpu.CompilerParams(
            dimension_semantics=("parallel", "parallel"),
            vmem_limit_bytes=vmem_limit),
    )(xyz1_bnc, xyz2_bcs, pts2_bsd)
    return out[:, :N, :] if N_pad > N else out


# ----------------------------------------------------------------------------
# Kernel 2: fused [BN+ReLU of previous layer] -> matmul -> per-channel stats.
#   grid = (n_groups, steps); "parallel" group axis (2 groups on v7x so both
#   TensorCores run), "arbitrary" step axis accumulating sum / sum-of-squares
#   into VMEM-resident per-group stats blocks.  Layer-0 variant fuses the
#   [points1, interpolated] concat as two MXU calls into one accumulator and
#   applies no pre-normalization.
# ----------------------------------------------------------------------------
def _mlp_layer_kernel(pre_norm, n_x, *refs):
    xs = refs[:n_x]
    pos = n_x
    if pre_norm:
        scale_ref, shift_ref = refs[pos], refs[pos + 1]
        pos += 2
    ws = refs[pos:pos + n_x]
    y_ref, sum_ref, ssq_ref = refs[pos + n_x:pos + n_x + 3]

    @pl.when(pl.program_id(1) == 0)
    def _init():
        sum_ref[...] = jnp.zeros_like(sum_ref)
        ssq_ref[...] = jnp.zeros_like(ssq_ref)

    acc = None
    for i in range(n_x):
        x = xs[i][...]                                   # bf16 tile straight from HBM
        if pre_norm:
            # Fused BatchNorm+ReLU of the previous layer's pre-activation,
            # applied in f32 and re-packed to bf16 for the MXU.
            x = jnp.maximum(x.astype(jnp.float32) * scale_ref[...] + shift_ref[...], 0.0)
            x = x.astype(jnp.bfloat16)
        part = jnp.dot(x, ws[i][...], preferred_element_type=jnp.float32)
        acc = part if acc is None else acc + part
    y_ref[...] = acc.astype(y_ref.dtype)
    # Stats accumulate in f32 from the f32 accumulator (row 0 of the 8-row block).
    sum_ref[0:1, :] += jnp.sum(acc, axis=0, keepdims=True)
    ssq_ref[0:1, :] += jnp.sum(acc * acc, axis=0, keepdims=True)


def mlp_layer(xs, ws, scale, shift, tp, n_groups, y_dtype, vmem_limit):
    P = xs[0].shape[0]
    cout = ws[0].shape[1]
    steps = P // (n_groups * tp)
    pre_norm = scale is not None
    n_x = len(xs)

    row_map = lambda g, s: (g * steps + s, 0)
    const_map = lambda g, s: (0, 0)
    grp_map = lambda g, s: (g, 0)

    in_specs = [pl.BlockSpec((tp, x.shape[1]), row_map) for x in xs]
    operands = list(xs)
    if pre_norm:
        in_specs += [pl.BlockSpec((1, xs[0].shape[1]), const_map)] * 2
        operands += [scale, shift]
    in_specs += [pl.BlockSpec(w.shape, const_map) for w in ws]
    operands += list(ws)

    kernel = functools.partial(_mlp_layer_kernel, pre_norm, n_x)
    return pl.pallas_call(
        kernel,
        out_shape=(jax.ShapeDtypeStruct((P, cout), y_dtype),
                   jax.ShapeDtypeStruct((8 * n_groups, cout), jnp.float32),
                   jax.ShapeDtypeStruct((8 * n_groups, cout), jnp.float32)),
        grid=(n_groups, steps),
        in_specs=in_specs,
        out_specs=(pl.BlockSpec((tp, cout), row_map),
                   pl.BlockSpec((8, cout), grp_map),
                   pl.BlockSpec((8, cout), grp_map)),
        compiler_params=pltpu.CompilerParams(
            dimension_semantics=("parallel", "arbitrary"),
            vmem_limit_bytes=vmem_limit),
    )(*operands)


# ----------------------------------------------------------------------------
# Module wrapper
# ----------------------------------------------------------------------------
class PointNetFeaturePropagationPallas:
    def __init__(self, in_channel, mlp, key, row_tile=None, n_tile=None):
        cfg = _device_config()
        rt = cfg["row_tile"] if row_tile is None else row_tile
        nt = cfg["n_tile"] if n_tile is None else n_tile
        # multiples of 16 so bf16 tiles pack cleanly on sublanes.
        self.row_tile = max(16, rt - rt % 16)
        self.n_tile = max(16, nt - nt % 16)
        self.vmem_limit = cfg["vmem_limit"]
        self.max_groups = cfg["n_groups"]

        self.params = []
        last = in_channel
        for out_channel in mlp:
            key, k1, k2 = jax.random.split(key, 3)
            bound = 1.0 / math.sqrt(last)  # torch Conv1d default init range
            w = jax.random.uniform(k1, (out_channel, last), jnp.float32, -bound, bound)
            b = jax.random.uniform(k2, (out_channel,), jnp.float32, -bound, bound)
            gamma = jnp.ones((out_channel,), jnp.float32)
            beta = jnp.zeros((out_channel,), jnp.float32)
            self.params.append((w, b, gamma, beta))
            last = out_channel

    def __call__(self, xyz1, xyz2, points1, points2):
        # xyz1 [B,3,N], xyz2 [B,3,S], points1 [B,D1,N] or None, points2 [B,D2,S]
        B, _, N = xyz1.shape
        S = xyz2.shape[2]
        pts2_bsd = jnp.transpose(points2.astype(jnp.bfloat16), (0, 2, 1))    # [B,S,D2] bf16
        D2 = pts2_bsd.shape[2]

        if S == 1:
            interpolated = jnp.broadcast_to(pts2_bsd, (B, N, D2))
        else:
            xyz1_bnc = jnp.transpose(xyz1, (0, 2, 1)).astype(jnp.float32)    # [B,N,3]
            interpolated = interpolate(xyz1_bnc, xyz2.astype(jnp.float32),
                                       pts2_bsd, self.n_tile, self.vmem_limit)

        P = B * N
        interp_flat = interpolated.reshape(P, D2)

        if points1 is not None:
            # Concat is fused into layer 0's matmul (never materialized in HBM).
            p1_flat = jnp.transpose(points1.astype(jnp.bfloat16), (0, 2, 1)).reshape(P, -1)
            x_inputs = [p1_flat, interp_flat]
        else:
            x_inputs = [interp_flat]

        n_groups = self.max_groups if (self.max_groups > 1 and P % 32 == 0) else 1
        tp = _pick_tile(P // n_groups, self.row_tile, 16)

        n_layers = len(self.params)
        scale = shift = None
        out = None
        for li, (w, _b, gamma, beta) in enumerate(self.params):
            # Conv1d bias dropped: exactly cancelled by batch-stat mean subtraction.
            wt = jnp.transpose(w).astype(jnp.bfloat16)        # [Cin, Cout] MXU operand
            if len(x_inputs) == 2:
                d1 = x_inputs[0].shape[1]
                ws = [wt[:d1, :], wt[d1:, :]]
            else:
                ws = [wt]
            last = li == n_layers - 1
            y, ysum, yssq = mlp_layer(
                x_inputs, ws, scale, shift, tp, n_groups,
                jnp.float32 if last else jnp.bfloat16, self.vmem_limit)

            # Per-channel scale/shift from the accumulated batch statistics.
            mean = jnp.sum(ysum, axis=0, keepdims=True) / P                 # (1, Cout)
            var = jnp.maximum(jnp.sum(yssq, axis=0, keepdims=True) / P - mean * mean, 0.0)
            g_scale = gamma.reshape(1, -1) * lax.rsqrt(var + 1e-5)
            g_shift = beta.reshape(1, -1) - mean * g_scale

            if last:
                # Final BN+ReLU + layout restore: left to XLA, which fuses it with
                # the transpose into a single pass over y.
                out = jnp.maximum(y * g_scale + g_shift, 0.0)
                out = jnp.transpose(out.reshape(B, N, -1), (0, 2, 1))        # [B, D', N]
            else:
                # Applied inside the NEXT layer's kernel (fused BN+ReLU).
                scale, shift = g_scale, g_shift
                x_inputs = [y]
        return out


# ----------------------------------------------------------------------------
# Pure-JAX reference mirroring the PyTorch forward (argsort + gather, with bias).
# ----------------------------------------------------------------------------
def reference_forward(params, xyz1, xyz2, points1, points2):
    xyz1 = jnp.transpose(xyz1, (0, 2, 1)).astype(jnp.float32)
    xyz2 = jnp.transpose(xyz2, (0, 2, 1)).astype(jnp.float32)
    p2 = jnp.transpose(points2, (0, 2, 1)).astype(jnp.float32)
    B, N, _ = xyz1.shape
    S = xyz2.shape[1]
    if S == 1:
        interpolated = jnp.broadcast_to(p2, (B, N, p2.shape[-1]))
    else:
        d = jnp.sum((xyz1[:, :, None, :] - xyz2[:, None, :, :]) ** 2, axis=-1)
        idx = jnp.argsort(d, axis=-1)[:, :, :3]
        dists = jnp.take_along_axis(d, idx, axis=-1)
        recip = 1.0 / (dists + 1e-8)
        weight = recip / jnp.sum(recip, axis=2, keepdims=True)
        gathered = jax.vmap(lambda p, i: p[i])(p2, idx)                      # [B,N,3,D2]
        interpolated = jnp.sum(gathered * weight[..., None], axis=2)
    if points1 is not None:
        p1 = jnp.transpose(points1, (0, 2, 1)).astype(jnp.float32)
        x = jnp.concatenate([p1, interpolated], axis=-1)
    else:
        x = interpolated
    for (w, b, g, be) in params:
        y = jnp.einsum("bnc,oc->bno", x, w, precision=jax.lax.Precision.HIGHEST) + b
        mean = jnp.mean(y, axis=(0, 1), keepdims=True)
        var = jnp.mean((y - mean) ** 2, axis=(0, 1), keepdims=True)
        x = jnp.maximum((y - mean) * lax.rsqrt(var + 1e-5) * g + be, 0.0)
    return jnp.transpose(x, (0, 2, 1))


if __name__ == "__main__":
    key = jax.random.PRNGKey(0)
    B, N, S, C = 2, 32, 8, 3
    D1, D2 = 4, 6
    mlp = [32, 16]

    k1, k2, k3, k4, k5 = jax.random.split(key, 5)
    xyz1 = jax.random.normal(k1, (B, C, N), jnp.float32)
    xyz2 = jax.random.normal(k2, (B, C, S), jnp.float32)
    points1 = jax.random.normal(k3, (B, D1, N), jnp.float32)
    points2 = jax.random.normal(k4, (B, D2, S), jnp.float32)

    # Small tile caps so the test exercises multi-tile grids, S padding, the
    # cross-tile BatchNorm-stats accumulation, and the fused BN+ReLU path.
    module = PointNetFeaturePropagationPallas(D1 + D2, mlp, k5, row_tile=32, n_tile=16)
    out = jax.block_until_ready(module(xyz1, xyz2, points1, points2))

    assert out.shape == (B, mlp[-1], N), out.shape
    ref = reference_forward(module.params, xyz1, xyz2, points1, points2)
    max_err = float(jnp.max(jnp.abs(out - ref)))
    # bf16 MXU operands + bf16 activation storage end-to-end (f32 accumulation /
    # f32 BN statistics) trade a small amount of precision for ~2x less HBM
    # traffic, hence the relaxed absolute tolerance on O(1) outputs.
    assert max_err < 1e-1, f"mismatch vs reference: {max_err}"
    print("KERNEL_OK")
</pallas_src>

<mosaic_0001>
module attributes {stable_mosaic.version = 11 : i64} {
  func.func @_interp_kernel(%arg0: i32, %arg1: i32, %arg2: memref<1x16x8xf32, #tpu.memory_space<vmem>>, %arg3: memref<1x8x128xf32, #tpu.memory_space<vmem>>, %arg4: memref<1x128x6xbf16, #tpu.memory_space<vmem>>, %arg5: memref<1x16x6xbf16, #tpu.memory_space<vmem>>) attributes {dimension_semantics = [#tpu.dimension_semantics<parallel>, #tpu.dimension_semantics<parallel>], iteration_bounds = array<i64: 2, 2>, scalar_prefetch = 0 : i64, scratch_operands = 0 : i64, tpu.core_type = #tpu.core_type<tc>, window_params = [{transform_indices = @transform_0, window_bounds = array<i64: 1, 16, 8>}, {transform_indices = @transform_1, window_bounds = array<i64: 1, 8, 128>}, {transform_indices = @transform_2, window_bounds = array<i64: 1, 128, 6>}, {transform_indices = @transform_3, window_bounds = array<i64: 1, 16, 6>}]} {
    %c0 = arith.constant 0 : index
    %c0_0 = arith.constant 0 : index
    %c0_1 = arith.constant 0 : index
    %0 = vector.load %arg2[%c0, %c0_0, %c0_1] : memref<1x16x8xf32, #tpu.memory_space<vmem>>, vector<1x16x8xf32>
    %1 = vector.shape_cast %0 : vector<1x16x8xf32> to vector<16x8xf32>
    %c0_2 = arith.constant 0 : index
    %c0_3 = arith.constant 0 : index
    %c0_4 = arith.constant 0 : index
    %2 = vector.load %arg3[%c0_2, %c0_3, %c0_4] : memref<1x8x128xf32, #tpu.memory_space<vmem>>, vector<1x8x128xf32>
    %3 = vector.shape_cast %2 : vector<1x8x128xf32> to vector<8x128xf32>
    %c0_5 = arith.constant 0 : index
    %c0_6 = arith.constant 0 : index
    %c0_7 = arith.constant 0 : index
    %4 = vector.load %arg4[%c0_5, %c0_6, %c0_7] : memref<1x128x6xbf16, #tpu.memory_space<vmem>>, vector<1x128x6xbf16>
    %5 = vector.shape_cast %4 : vector<1x128x6xbf16> to vector<128x6xbf16>
    %6 = arith.truncf %1 : vector<16x8xf32> to vector<16x8xbf16>
    %7 = arith.extf %6 : vector<16x8xbf16> to vector<16x8xf32>
    %8 = arith.subf %1, %7 : vector<16x8xf32>
    %9 = arith.truncf %8 : vector<16x8xf32> to vector<16x8xbf16>
    %10 = arith.truncf %3 : vector<8x128xf32> to vector<8x128xbf16>
    %11 = arith.extf %10 : vector<8x128xbf16> to vector<8x128xf32>
    %12 = arith.subf %3, %11 : vector<8x128xf32>
    %13 = arith.truncf %12 : vector<8x128xf32> to vector<8x128xbf16>
    %cst = arith.constant dense<0.000000e+00> : vector<16x128xf32>
    %14 = tpu.matmul %6, %10, %cst {dimension_numbers = #tpu.dot_dimension_numbers<[1], [0], [0], [1], [0, 0, 1, 1], [], []>} : vector<16x8xbf16>, vector<8x128xbf16>, vector<16x128xf32> -> vector<16x128xf32>
    %cst_8 = arith.constant dense<0.000000e+00> : vector<16x128xf32>
    %15 = tpu.matmul %6, %13, %cst_8 {dimension_numbers = #tpu.dot_dimension_numbers<[1], [0], [0], [1], [0, 0, 1, 1], [], []>} : vector<16x8xbf16>, vector<8x128xbf16>, vector<16x128xf32> -> vector<16x128xf32>
    %16 = arith.addf %14, %15 : vector<16x128xf32>
    %cst_9 = arith.constant dense<0.000000e+00> : vector<16x128xf32>
    %17 = tpu.matmul %9, %10, %cst_9 {dimension_numbers = #tpu.dot_dimension_numbers<[1], [0], [0], [1], [0, 0, 1, 1], [], []>} : vector<16x8xbf16>, vector<8x128xbf16>, vector<16x128xf32> -> vector<16x128xf32>
    %18 = arith.addf %16, %17 : vector<16x128xf32>
    %19 = arith.mulf %1, %1 : vector<16x8xf32>
    %cst_10 = arith.constant dense<0.000000e+00> : vector<16xf32>
    %20 = vector.multi_reduction <add>, %19, %cst_10 [1] : vector<16x8xf32> to vector<16xf32>
    %21 = vector.shape_cast %20 : vector<16xf32> to vector<16x1xf32>
    %22 = arith.mulf %3, %3 : vector<8x128xf32>
    %cst_11 = arith.constant dense<0.000000e+00> : vector<128xf32>
    %23 = vector.multi_reduction <add>, %22, %cst_11 [0] : vector<8x128xf32> to vector<128xf32>
    %24 = vector.shape_cast %23 : vector<128xf32> to vector<1x128xf32>
    %cst_12 = arith.constant 2.000000e+00 : f32
    %25 = vector.broadcast %cst_12 : f32 to vector<16x128xf32>
    %26 = arith.mulf %25, %18 : vector<16x128xf32>
    %27 = vector.broadcast %24 : vector<1x128xf32> to vector<16x128xf32>
    %28 = arith.subf %27, %26 : vector<16x128xf32>
    %29 = vector.broadcast %21 : vector<16x1xf32> to vector<16x128xf32>
    %30 = arith.addf %28, %29 : vector<16x128xf32>
    %cst_13 = arith.constant 0.000000e+00 : f32
    %31 = vector.broadcast %cst_13 : f32 to vector<16x128xf32>
    %32 = arith.maximumf %30, %31 : vector<16x128xf32>
    %cst_14 = arith.constant 9.99999993E-9 : f32
    %33 = vector.broadcast %cst_14 : f32 to vector<16x128xf32>
    %34 = arith.addf %32, %33 : vector<16x128xf32>
    %35 = tpu.iota {dimensions = array<i32: 1>} : vector<16x128xi32>
    %36 = tpu.bitcast %34 : vector<16x128xf32> -> vector<16x128xi32>
    %c-128_i32 = arith.constant -128 : i32
    %37 = vector.broadcast %c-128_i32 : i32 to vector<16x128xi32>
    %38 = arith.andi %36, %37 : vector<16x128xi32>
    %39 = arith.ori %38, %35 : vector<16x128xi32>
    %40 = tpu.bitcast %39 : vector<16x128xi32> -> vector<16x128xf32>
    %cst_15 = arith.constant dense<0x7F800000> : vector<16xf32>
    %41 = vector.multi_reduction <minimumf>, %40, %cst_15 [1] : vector<16x128xf32> to vector<16xf32>
    %42 = vector.shape_cast %41 : vector<16xf32> to vector<16x1xf32>
    %43 = vector.broadcast %42 : vector<16x1xf32> to vector<16x128xf32>
    %44 = arith.cmpf oeq, %40, %43 : vector<16x128xf32>
    %cst_16 = arith.constant 0x7F800000 : f32
    %45 = vector.broadcast %cst_16 : f32 to vector<16x128xf32>
    %46 = arith.select %44, %45, %40 : vector<16x128xi1>, vector<16x128xf32>
    %cst_17 = arith.constant dense<0x7F800000> : vector<16xf32>
    %47 = vector.multi_reduction <minimumf>, %46, %cst_17 [1] : vector<16x128xf32> to vector<16xf32>
    %48 = vector.shape_cast %47 : vector<16xf32> to vector<16x1xf32>
    %49 = vector.broadcast %48 : vector<16x1xf32> to vector<16x128xf32>
    %50 = arith.cmpf oeq, %46, %49 : vector<16x128xf32>
    %cst_18 = arith.constant 0x7F800000 : f32
    %51 = vector.broadcast %cst_18 : f32 to vector<16x128xf32>
    %52 = arith.select %50, %51, %46 : vector<16x128xi1>, vector<16x128xf32>
    %cst_19 = arith.constant dense<0x7F800000> : vector<16xf32>
    %53 = vector.multi_reduction <minimumf>, %52, %cst_19 [1] : vector<16x128xf32> to vector<16xf32>
    %54 = vector.shape_cast %53 : vector<16xf32> to vector<16x1xf32>
    %55 = tpu.reciprocal %34 {approx = true} : vector<16x128xf32> -> vector<16x128xf32>
    %56 = vector.broadcast %54 : vector<16x1xf32> to vector<16x128xf32>
    %57 = arith.cmpf ole, %40, %56 : vector<16x128xf32>
    %cst_20 = arith.constant 0.000000e+00 : f32
    %58 = vector.broadcast %cst_20 : f32 to vector<16x128xf32>
    %59 = arith.select %57, %55, %58 : vector<16x128xi1>, vector<16x128xf32>
    %cst_21 = arith.constant dense<0.000000e+00> : vector<16xf32>
    %60 = vector.multi_reduction <add>, %59, %cst_21 [1] : vector<16x128xf32> to vector<16xf32>
    %61 = vector.shape_cast %60 : vector<16xf32> to vector<16x1xf32>
    %62 = arith.truncf %59 : vector<16x128xf32> to vector<16x128xbf16>
    %cst_22 = arith.constant dense<0.000000e+00> : vector<16x6xf32>
    %63 = tpu.matmul %62, %5, %cst_22 {dimension_numbers = #tpu.dot_dimension_numbers<[1], [0], [0], [1], [0, 0, 1, 1], [], []>} : vector<16x128xbf16>, vector<128x6xbf16>, vector<16x6xf32> -> vector<16x6xf32>
    %64 = tpu.reciprocal %61 {approx = true} : vector<16x1xf32> -> vector<16x1xf32>
    %65 = vector.broadcast %64 : vector<16x1xf32> to vector<16x6xf32>
    %66 = arith.mulf %63, %65 : vector<16x6xf32>
    %67 = arith.truncf %66 : vector<16x6xf32> to vector<16x6xbf16>
    %c0_23 = arith.constant 0 : index
    %c0_24 = arith.constant 0 : index
    %c0_25 = arith.constant 0 : index
    %68 = vector.load %arg5[%c0_23, %c0_24, %c0_25] : memref<1x16x6xbf16, #tpu.memory_space<vmem>>, vector<1x16x6xbf16>
    %69 = vector.shape_cast %68 : vector<1x16x6xbf16> to vector<16x6xbf16>
    %70 = vector.shape_cast %67 : vector<16x6xbf16> to vector<1x16x6xbf16>
    tpu.vector_store %arg5[%c0_23, %c0_24, %c0_25], %70 {strides = array<i32>} : memref<1x16x6xbf16, #tpu.memory_space<vmem>>, vector<1x16x6xbf16>,
    return
  }
  func.func @transform_0(%arg0: i32, %arg1: i32) -> (i32, i32, i32) {
    %c0_i32 = arith.constant 0 : i32
    %c0_i32_0 = arith.constant 0 : i32
    return %arg0, %arg1, %c0_i32 : i32, i32, i32
  }
  func.func @transform_1(%arg0: i32, %arg1: i32) -> (i32, i32, i32) {
    %c0_i32 = arith.constant 0 : i32
    %c0_i32_0 = arith.constant 0 : i32
    %c0_i32_1 = arith.constant 0 : i32
    return %arg0, %c0_i32, %c0_i32_0 : i32, i32, i32
  }
  func.func @transform_2(%arg0: i32, %arg1: i32) -> (i32, i32, i32) {
    %c0_i32 = arith.constant 0 : i32
    %c0_i32_0 = arith.constant 0 : i32
    %c0_i32_1 = arith.constant 0 : i32
    return %arg0, %c0_i32, %c0_i32_0 : i32, i32, i32
  }
  func.func @transform_3(%arg0: i32, %arg1: i32) -> (i32, i32, i32) {
    %c0_i32 = arith.constant 0 : i32
    %c0_i32_0 = arith.constant 0 : i32
    return %arg0, %arg1, %c0_i32 : i32, i32, i32
  }
}

</mosaic_0001>

<bundles_post_ra>
// kernel: tpu_custom_call.1
= control target key start
LH: loop header
LB: loop body
LE: loop exit
PB: predicated region body
PF: predicated region fallthrough
CT: control target
= control target key end

     0   :  { %s763_s12 = smov 0   ;;  %s765_s13 = smov 0   ;;  %s836_s0 = inlined_call_operand.vmem [shape: f32[2,32,8], index: 0, kind: input, shape index: {}]   ;;  %s837_s1 = inlined_call_operand.vmem [shape: f32[2,8,128], index: 1, kind: input, shape index: {}]   ;;  %s838_s2 = inlined_call_operand.vmem [shape: bf16[2,128,6], index: 2, kind: input, shape index: {}]   ;;  %s839_s3 = inlined_call_operand.vmem [shape: bf16[2,32,6], index: 3, kind: output, shape index: {}]  }
   0x1   :  { %s767_s14 = smov 0   ;;  %s769_s15 = smov 0  }
   0x2   :  { %s771_s16 = smov 0  }
   0x3 LB: > { %s22_s17 = sadd.s32 1, %s733_s14  ;;  %s25_s18 = sadd.s32 1, %s737_s15  ;;  %s741_s16 = sphi %s771_s16, %s13_s16   ;;  %s737_s15 = sphi %s769_s15, %s843_s15   ;;  %s733_s14 = sphi %s767_s14, %s842_s14   ;;  %s729_s13 = sphi %s765_s13, %s841_s13   ;;  %s725_s12 = sphi %s763_s12, %s840_s12  }
   0x4   : > { %p23_p0 = scmp.ge.s32.totalorder %s22_s17, 2  ;;  %p596_p1 = scmp.ge.s32.totalorder %s741_s16, 1 }
   0x5   : > { %p177_p2 = scmp.lt.s32.totalorder %s741_s16, 5 }
   0x6   : > { %s845_s17 = smov (%p23_p0, %s22_s17), 0  ;;  %s847_s18 = smov (!%p23_p0, %s25_s18), %s737_s15 }
   0x7   : > { %p178_p3 = pnand %p596_p1, %p177_p2  ;;  %p27_p4 = scmp.ge.s32.totalorder %s847_s18, 2 }
   0x8   : > { %p219_p5 = scmp.lt.s32.totalorder (!%p178_p3), %s729_s13, 1  ;;  %s597_s19 = sshll.u32 (!%p178_p3), %s725_s12, 1 }
   0x9   : > { %s849_s18 = smov (%p27_p4, %s847_s18), 0  ;;  %181 = sbr.rel (%p178_p3) target bundleno = 684 (0x2ac), region = 32 }
   0xa   : > { %p221_p6 = scmp.lt.s32.totalorder (!%p178_p3), %s597_s19, 3 }
   0xe   : > { %s851_s13 = smov (!%p219_p5, %s729_s13), 1  ;;  %s853_s19 = smov (!%p221_p6, %s597_s19), 3  ;;  %vm287_vm0 = vcmask 1043456   ;;  %vm283_vm1 = vcmask 64512   ;;  %v366_v41 = vlaneseq  ;;  %vm475_vm9 = vcmask 44032  }
   0xf   : > { %s600_s20 = sshll.u32 %s851_s13, 3  ;;  %s598_s24 = sshll.u32 %s851_s13, 2 }
  0x10   : > { %s231_s23 = scalar_lea.vmem %s837_s1, %s600_s20  ;;  %s800_s25 = sadd.s32 %s598_s24, %s853_s19  ;;  %v367_v46 = vand.u32 127, %v366_v41 }
  0x11   : > { %v250_v0 = vld [vmem:[%s231_s23] sm:$0xff]  ;;  %s599_s26 = sshll.u32 %s800_s25, 3  ;;  %s646_s30 = sshll.u32 %s851_s13, 6 }
  0x12   : > { %v274_v1 = vpack.c.bf16 %v250_v0, %v250_v0  ;;  %s226_s29 = scalar_lea.vmem %s836_s0, %s599_s26  ;;  %v349_v23 = vmul.f32 %v250_v0, %v250_v0  ;;  %s236_s6 = scalar_lea.vmem %s838_s2, %s646_s30 }
  0x13   : > { %v248_v4 = vld [vmem:[%s226_s29] sm:$0xff]  ;;  %v249_v5 = vld [vmem:[%s226_s29 + $0x8] sm:$0xff]  ;;  %s605_s7 = sshll.u32 %s800_s25, 2 }
  0x14   : > { %v306_v2 = vsel %vm287_vm0, %v274_v1, 0  ;;  %v275_v3 = vunpack.c.l.bf16 %v274_v1  ;;  %v267_v6 = vpack.c.bf16 %v248_v4, %v248_v4  ;;  %v268_v7 = vpack.c.bf16 %v249_v5, %v249_v5  ;;  %v654_v1 = vld [vmem:[%s236_s6 + $0x38] sm:$0xff]  ;;  %s245_s10 = scalar_lea.vmem %s839_s3, %s605_s7 }
  0x15   : > { %315 = vmatpush.bf16.msra.mxu1 %v306_v2  ;;  %332 = vmatpush.bf16.msra.mxu2 %v306_v2  ;;  %v341_v9 = vmul.f32 %v248_v4, %v248_v4  ;;  %v342_v20 = vmul.f32 %v249_v5, %v249_v5  ;;  %v350_v24 = vrot.slane %v349_v23, 4  ;;  %v653_v2 = vld [vmem:[%s236_s6 + $0x30] sm:$0xff] }
  0x16   : > { %v276_v8 = vsub.f32 %v250_v0, %v275_v3  ;;  %v280_v10 = vunpack.c.l.b16 %v267_v6  ;;  %v281_v11 = vunpack.c.l.b16 %v268_v7  ;;  %v269_v13 = vunpack.c.l.bf16 %v267_v6  ;;  %455 = vmatpush.bf16.msra.mxu3 %v654_v1  ;;  %v652_v3 = vld [vmem:[%s236_s6 + $0x28] sm:$0xff]  ;;  %v649_v6 = vld [vmem:[%s236_s6 + $0x10] sm:$0xff] }
  0x17   : > { %v270_v14 = vunpack.c.l.bf16 %v268_v7  ;;  %v343_v15 = vsel %vm283_vm1, %v341_v9, 0.0  ;;  %v346_v22 = vsel %vm283_vm1, %v342_v20, 0.0  ;;  %v351_v25 = vadd.f32 %v350_v24, %v349_v23 }
  0x18   : > { %v277_v12 = vpack.c.bf16 %v276_v8, %v276_v8  ;;  %v282_v16 = vpack.c.b16 %v281_v11, %v280_v10  ;;  %v271_v18 = vsub.f32 %v248_v4, %v269_v13  ;;  %344 = vadd.xlane.f32.xlu0 %v343_v15  ;;  %v651_v4 = vld [vmem:[%s236_s6 + $0x20] sm:$0xff]  ;;  %v648_v11 = vld [vmem:[%s236_s6 + $0x8] sm:$0xff] }
  0x19   : > { %v272_v19 = vsub.f32 %v249_v5, %v270_v14  ;;  %v352_v26 = vrot.slane %v351_v25, 2  ;;  %v650_v5 = vld [vmem:[%s236_s6 + $0x18] sm:$0xff] }
  0x1a   : > { %v289_v17 = vsel %vm287_vm0, %v277_v12, 0  ;;  %607 = vmatmul.msk.bf16.vlgmr.msra.gmra.mxu1 %vm283_vm1, %v282_v16  ;;  %456 = vmatpush.bf16.msra.mxu3 %v653_v2  ;;  %v647_v12 = vld [vmem:[%s236_s6] sm:$0xff] }
  0x1b   : > { %298 = vmatpush.bf16.msra.mxu0 %v289_v17  ;;  %v273_v21 = vpack.c.bf16 %v272_v19, %v271_v18  ;;  %v353_v27 = vadd.f32 %v352_v26, %v351_v25 }
  0x1d   : > { %608 = vmatmul.msk.bf16.vlgmr.msra.gmra.mxu2 %vm283_vm1, %v273_v21  ;;  %v354_v31 = vrot.slane %v353_v27, 1 }
  0x1e   : > { %606 = vmatmul.msk.bf16.vlgmr.msra.gmra.mxu0 %vm283_vm1, %v282_v16  ;;  %457 = vmatpush.bf16.msra.mxu3 %v652_v3 }
  0x1f   : > { %v355_v34 = vadd.f32 %v354_v31, %v353_v27 }
  0x20   : > { %347 = vadd.xlane.f32.xlu0 %v346_v22 }
  0x22   : > { %458 = vmatpush.bf16.msra.mxu3 %v651_v4 }
  0x26   : > { %459 = vmatpush.bf16.msra.mxu3 %v650_v5 }
  0x2a   : > { %460 = vmatpush.bf16.msra.mxu3 %v649_v6 }
  0x2e   : > { %461 = vmatpush.bf16.msra.mxu3 %v648_v11 }
  0x32   : > { %462 = vmatpush.bf16.msra.mxu3 %v647_v12 }
  0x8b   : > { %v345_v35 = vpop.xlane.xlu0 %344 }
  0x93   : > { %v348_v49 = vpop.xlane.xlu0 %347 }
  0x97   : > { %v317_v29 = vpop.f32.mrf.mxu1 }
  0x9b   : > { %v300_v28 = vpop.f32.mrf.mxu0 }
  0x9c   : > { %v318_v30 = vadd.f32 %v317_v29, %v300_v28 }
  0x9f   : > { %v319_v39 = vpop.f32.mrf.mxu1 }
  0xa0   : > { %v334_v32 = vpop.f32.mrf.mxu2 }
  0xa1   : > { %v339_v33 = vadd.f32 %v334_v32, %v318_v30 }
  0xa3   : > { %v356_v36 = vmul.f32 2.0, %v339_v33  ;;  %v302_v37 = vpop.f32.mrf.mxu0 }
  0xa4   : > { %v320_v40 = vadd.f32 %v319_v39, %v302_v37 }
  0xa5   : > { %v358_v38 = vsub.f32 %v355_v34, %v356_v36 }
  0xa7   : > { %v360_v42 = vadd.f32 %v358_v38, %v345_v35 }
  0xa8   : > { %v336_v43 = vpop.f32.mrf.mxu2 }
  0xa9   : > { %v362_v44 = vmax.f32 %v360_v42, 0.0  ;;  %v340_v45 = vadd.f32 %v336_v43, %v320_v40 }
  0xab   : > { %v364_v47 = vadd.f32 1e-08, %v362_v44  ;;  %v357_v48 = vmul.f32 2.0, %v340_v45 }
  0xad   : > { %v370_v50 = vand.u32 4294967168, %v364_v47  ;;  %v359_v51 = vsub.f32 %v355_v34, %v357_v48  ;;  %695 = vrcp.f32 %v364_v47 }
  0xaf   : > { %v372_v52 = vor.u32 %v370_v50, %v367_v46  ;;  %v361_v53 = vadd.f32 %v359_v51, %v348_v49 }
  0xb1   : > { %v363_v54 = vmax.f32 %v361_v53, 0.0  ;;  %376 = vmin.xlane.f32.xlu1 %v372_v52 }
  0xb3   : > { %v365_v55 = vadd.f32 1e-08, %v363_v54  ;;  %v696_v58 = vpop.eup %695 }
  0xb5   : > { %v371_v56 = vand.u32 4294967168, %v365_v55  ;;  %697 = vrcp.f32 %v365_v55 }
  0xb7   : > { %v373_v57 = vor.u32 %v371_v56, %v367_v46 }
  0xb9   : > { %378 = vmin.xlane.f32.xlu1 %v373_v57 }
  0xbb   : > { %v698_v59 = vpop.eup %697 }
  0xbc   : > { %v642_v60 = vpack.c.bf16 %v698_v59, %v696_v58 }
 0x124   : > { %v377_v61 = vpop.xlane.xlu1 %376 }
 0x125   : > { %vm380_vm2 = vcmp.eq.f32.partialorder %v372_v52, %v377_v61 }
 0x126   : > { %v382_v62 = vsel %vm380_vm2, inf, %v372_v52 }
 0x127   : > { %384 = vmin.xlane.f32.xlu2 %v382_v62 }
 0x12c   : > { %v379_v63 = vpop.xlane.xlu1 %378 }
 0x12d   : > { %vm381_vm3 = vcmp.eq.f32.partialorder %v373_v57, %v379_v63 }
 0x12e   : > { %v383_v0 = vsel %vm381_vm3, inf, %v373_v57 }
 0x12f   : > { %386 = vmin.xlane.f32.xlu2 %v383_v0 }
 0x19a   : > { %v385_v7 = vpop.xlane.xlu2 %384 }
 0x19b   : > { %vm388_vm4 = vcmp.eq.f32.partialorder %v382_v62, %v385_v7 }
 0x19c   : > { %v390_v8 = vsel %vm388_vm4, inf, %v382_v62 }
 0x19d   : > { %392 = vmin.xlane.f32.xlu0 %v390_v8 }
 0x1a2   : > { %v387_v9 = vpop.xlane.xlu2 %386 }
 0x1a3   : > { %vm389_vm5 = vcmp.eq.f32.partialorder %v383_v0, %v387_v9 }
 0x1a4   : > { %v391_v10 = vsel %vm389_vm5, inf, %v383_v0 }
 0x1a5   : > { %394 = vmin.xlane.f32.xlu1 %v391_v10 }
 0x210   : > { %v393_v13 = vpop.xlane.xlu0 %392 }
 0x211   : > { %vm398_vm6 = vcmp.le.f32.partialorder %v372_v52, %v393_v13 }
 0x212   : > { %v400_v14 = vsel %vm398_vm6, %v696_v58, 0.0 }
 0x213   : > { %402 = vadd.xlane.f32.xlu2 %v400_v14 }
 0x218   : > { %v395_v15 = vpop.xlane.xlu1 %394 }
 0x219   : > { %vm399_vm7 = vcmp.le.f32.partialorder %v373_v57, %v395_v15 }
 0x21a   : > { %vm641_vm8 = vmpackc.low %vm399_vm7, %vm398_vm6  ;;  %v401_v16 = vsel %vm399_vm7, %v698_v59, 0.0 }
 0x21b   : > { %643 = vmatmul.msk.bf16.vlgmr.msra.gmra.mxu3 %vm641_vm8, %v642_v60  ;;  %404 = vadd.xlane.f32.xlu0 %v401_v16 }
 0x286   : > { %v403_v17 = vpop.xlane.xlu2 %402 }
 0x287   : > { %699 = vrcp.f32 %v403_v17 }
 0x28d   : > { %v700_v19 = vpop.eup %699 }
 0x28e   : > { %v405_v18 = vpop.xlane.xlu0 %404 }
 0x28f   : > { %701 = vrcp.f32 %v405_v18 }
 0x295   : > { %v702_v23 = vpop.eup %701 }
 0x29e   : > { %v464_v20 = vpop.f32.mrf.mxu3 }
 0x29f   : > { %v471_v21 = vmul.f32 %v700_v19, %v464_v20 }
 0x2a1   : > { %v473_v22 = vpack.c.bf16 %v471_v21, %v471_v21 }
 0x2a3   : > { %476 = vst.msk [vmem:[%s245_s10] sm:$0xf] %vm475_vm9, %v473_v22 }
 0x2a6   : > { %v466_v24 = vpop.f32.mrf.mxu3 }
 0x2a7   : > { %v472_v25 = vmul.f32 %v702_v23, %v466_v24 }
 0x2a9   : > { %v474_v26 = vpack.c.bf16 %v472_v25, %v472_v25 }
 0x2ab   : > { %477 = vst.msk [vmem:[%s245_s10 + $0x4] sm:$0xf] %vm475_vm9, %v474_v26 }
 0x2ac PF: > { %s13_s16 = sadd.s32 1, %s741_s16   ;;  %s840_s12 = smov %s733_s14 }
 0x2ad   : > { %p10_p7 = scmp.ge.s32.totalorder %s13_s16, 6   ;;  %s841_s13 = smov %s737_s15 }
 0x2ae   : > { %s842_s14 = smov %s845_s17  ;;  %s843_s15 = smov %s849_s18 }
 0x2af   :  { %12 = sbr.rel (!%p10_p7) target bundleno = 3 (0x3), region = 68 }

</bundles_post_ra>
